<compile_context>
chip_gen: v5e
topology: v5e:2x2
jax: 0.10.0
libtpu: 0.0.40
codegen_flags: <defaults>
</compile_context>

<pallas_src>
import numpy as np
import jax
import jax.numpy as jnp
from jax.experimental import pallas as pl
from jax.experimental.pallas import tpu as pltpu


def _round_up(x: int, m: int) -> int:
    return ((x + m - 1) // m) * m


def _vmem_footprint(shape, dtype) -> int:
    """Approximate VMEM bytes of a buffer after (sublane, lane) tiling pad."""
    itemsize = jnp.dtype(dtype).itemsize
    packing = max(1, 4 // itemsize)
    dims = list(shape)
    if len(dims) >= 1:
        dims[-1] = _round_up(dims[-1], 128)
    if len(dims) >= 2:
        dims[-2] = _round_up(dims[-2], 8 * packing)
    n = 1
    for d in dims:
        n *= d
    return n * itemsize


def _choose_batch_tile(B: int, sublane: int) -> int:
    """Largest sublane-aligned divisor of B that is <= min(B//2, 512).

    Guarantees >=2 batch tiles whenever possible (v7x: both TensorCores get
    work) while keeping tiles big enough to amortize per-grid-step overhead.
    Falls back to a single full-extent tile (always legal) otherwise.
    """
    if B % sublane != 0:
        return B
    best = B
    t = sublane
    limit = min(B // 2, 512)
    while t <= limit:
        if B % t == 0:
            best = t
        t += sublane
    return best


def _layer_stepper_kernel(z_ref, a_ref, wf_ref, wc_ref, b_ref, o_ref, z_acc):
    """One grid step = one LayerStepper application on one batch tile.

    Grid = (batch_tiles [parallel], num_steps [arbitrary]).  z lives in the
    f32 VMEM scratch `z_acc` across the whole step axis; only the final step
    writes the output block (written back to HBM once per batch tile).
    """
    s = pl.program_id(1)
    cd = wf_ref.dtype
    prec = jax.lax.Precision.HIGHEST if cd == jnp.float32 else None

    @pl.when(s == 0)
    def _init():
        z_acc[...] = z_ref[...].astype(jnp.float32)

    z_new = (
        jnp.dot(z_acc[...].astype(cd), wf_ref[...],
                preferred_element_type=jnp.float32, precision=prec)
        + jnp.dot(a_ref[...].astype(cd), wc_ref[...],
                  preferred_element_type=jnp.float32, precision=prec)
        + b_ref[...]                      # pre-fused (bf + bc), f32, (1, H)
    )
    z_acc[...] = z_new

    @pl.when(s == pl.num_programs(1) - 1)
    def _finish():
        o_ref[...] = z_new.astype(o_ref.dtype)


def prepare_layer_stepper_params(wf, bf, wc, bc, *, compute_dtype=jnp.bfloat16):
    """One-time parameter prep (NOT per call).

    Accepts either single-step params (PyTorch nn.Linear layout)
      wf: (H, H), bf: (H,), wc: (H, C), bc: (H,)
    or stacked per-step params with a leading step axis S.

    Returns a dict with:
      wf_t: (S, H, H)  transposed forward weight in compute_dtype
      wc_t: (S, C, H)  transposed code weight in compute_dtype
      b:    (S, 1, H)  pre-fused bias (bf + bc), float32
    """
    wf, bf, wc, bc = map(jnp.asarray, (wf, bf, wc, bc))
    if wf.ndim == 2:
        wf, bf, wc, bc = wf[None], bf[None], wc[None], bc[None]
    S, H, H2 = wf.shape
    C = wc.shape[-1]
    if H2 != H or wc.shape != (S, H, C) or bf.shape != (S, H) or bc.shape != (S, H):
        raise ValueError(
            f"inconsistent LayerStepper params: wf{wf.shape} bf{bf.shape} "
            f"wc{wc.shape} bc{bc.shape}")
    return {
        "wf_t": jnp.swapaxes(wf, -1, -2).astype(compute_dtype),   # (S, H, H)
        "wc_t": jnp.swapaxes(wc, -1, -2).astype(compute_dtype),   # (S, C, H)
        "b": (bf + bc).astype(jnp.float32).reshape(S, 1, H),      # (S, 1, H)
    }


def layer_stepper(z, a, params):
    """Apply all S fused stepper applications in one pallas_call.

    z: (B, H), a: (B, C).  S == 1 is exactly the module's forward().
    Returns (B, H) in z.dtype.
    """
    wf_t, wc_t, b = params["wf_t"], params["wc_t"], params["b"]
    S, H, _ = wf_t.shape
    C = wc_t.shape[1]
    if z.ndim != 2 or a.ndim != 2:
        raise ValueError("z and a must be rank-2 (batch, features)")
    B = z.shape[0]
    if z.shape != (B, H) or a.shape != (B, C):
        raise ValueError(
            f"z{z.shape} / a{a.shape} inconsistent with prepared params "
            f"(H={H}, C={C})")

    cd = wf_t.dtype
    out_dtype = z.dtype

    sublane = 8 * max(1, 4 // jnp.dtype(z.dtype).itemsize)   # 8 f32 / 16 bf16
    tb = _choose_batch_tile(B, sublane)
    n_tiles = B // tb

    # Explicit VMEM budget (double-buffered streamed weights + act/out tiles
    # + resident f32 accumulator), clamped so it is valid on v7x (64 MiB).
    vmem_needed = (
        2 * (_vmem_footprint((H, H), cd) + _vmem_footprint((C, H), cd)
             + _vmem_footprint((1, H), jnp.float32))
        + 2 * (_vmem_footprint((tb, H), z.dtype) + _vmem_footprint((tb, C), a.dtype))
        + 2 * _vmem_footprint((tb, H), out_dtype)
        + _vmem_footprint((tb, H), jnp.float32)
    )
    vmem_limit = int(min(64 << 20, max(32 << 20, 2 * vmem_needed)))

    w_itemsize = jnp.dtype(cd).itemsize
    cost = pl.CostEstimate(
        flops=int(2 * B * S * (H * H + C * H)),
        transcendentals=0,
        bytes_accessed=int(
            n_tiles * S * (H * H + C * H) * w_itemsize      # weights re-streamed per tile
            + B * H * jnp.dtype(z.dtype).itemsize
            + B * C * jnp.dtype(a.dtype).itemsize
            + S * H * 4
            + B * H * jnp.dtype(out_dtype).itemsize),
    )

    return pl.pallas_call(
        _layer_stepper_kernel,
        out_shape=jax.ShapeDtypeStruct((B, H), out_dtype),
        grid_spec=pltpu.PrefetchScalarGridSpec(
            num_scalar_prefetch=0,
            grid=(n_tiles, S),
            in_specs=[
                # Activations: one DMA per batch tile (index constant over steps).
                pl.BlockSpec((tb, H), lambda i, s: (i, 0)),          # z
                pl.BlockSpec((tb, C), lambda i, s: (i, 0)),          # a
                # Per-step params streamed along the step axis (double-buffered).
                pl.BlockSpec((None, H, H), lambda i, s: (s, 0, 0)),  # Wf^T
                pl.BlockSpec((None, C, H), lambda i, s: (s, 0, 0)),  # Wc^T
                pl.BlockSpec((None, 1, H), lambda i, s: (s, 0, 0)),  # bf + bc
            ],
            out_specs=pl.BlockSpec((tb, H), lambda i, s: (i, 0)),    # written at last step
            scratch_shapes=[pltpu.VMEM((tb, H), jnp.float32)],       # resident z (f32)
        ),
        compiler_params=pltpu.CompilerParams(
            dimension_semantics=("parallel", "arbitrary"),
            vmem_limit_bytes=vmem_limit,
        ),
        cost_estimate=cost,
    )(z, a, wf_t, wc_t, b)


if __name__ == "__main__":
    batch, hidden_dim, code_dim = 8, 32, 16

    key = jax.random.PRNGKey(0)
    kz, ka, kwf, kbf, kwc, kbc, kmulti = jax.random.split(key, 7)

    z = jax.random.normal(kz, (batch, hidden_dim), dtype=jnp.float32)
    a = jax.random.normal(ka, (batch, code_dim), dtype=jnp.float32)

    bound_f = 1.0 / (hidden_dim ** 0.5)
    bound_c = 1.0 / (code_dim ** 0.5)
    wf = jax.random.uniform(kwf, (hidden_dim, hidden_dim), minval=-bound_f, maxval=bound_f)
    bf = jax.random.uniform(kbf, (hidden_dim,), minval=-bound_f, maxval=bound_f)
    wc = jax.random.uniform(kwc, (hidden_dim, code_dim), minval=-bound_c, maxval=bound_c)
    bc = jax.random.uniform(kbc, (hidden_dim,), minval=-bound_c, maxval=bound_c)

    # Host float64 reference for the module forward (one step).
    z_np, a_np = np.asarray(z, np.float64), np.asarray(a, np.float64)
    wf_np, bf_np = np.asarray(wf, np.float64), np.asarray(bf, np.float64)
    wc_np, bc_np = np.asarray(wc, np.float64), np.asarray(bc, np.float64)
    ref1 = z_np @ wf_np.T + bf_np + a_np @ wc_np.T + bc_np

    # --- single step, f32 compute: exact module semantics ---
    # (Tolerance is kept loose enough to be robust to MXU pass decomposition.)
    params_f32 = prepare_layer_stepper_params(wf, bf, wc, bc, compute_dtype=jnp.float32)
    out1 = jax.block_until_ready(layer_stepper(z, a, params_f32))
    assert out1.shape == (batch, hidden_dim)
    assert np.allclose(np.asarray(out1, np.float64), ref1, atol=1e-2, rtol=1e-2), \
        "single-step f32 mismatch vs reference"

    # --- fused multi-step path: z resident in VMEM, per-step weights streamed ---
    num_steps = 4
    ks = jax.random.split(kmulti, 4)
    wf_s = jax.random.uniform(ks[0], (num_steps, hidden_dim, hidden_dim),
                              minval=-bound_f, maxval=bound_f)
    bf_s = jax.random.uniform(ks[1], (num_steps, hidden_dim), minval=-bound_f, maxval=bound_f)
    wc_s = jax.random.uniform(ks[2], (num_steps, hidden_dim, code_dim),
                              minval=-bound_c, maxval=bound_c)
    bc_s = jax.random.uniform(ks[3], (num_steps, hidden_dim), minval=-bound_c, maxval=bound_c)

    params_multi = prepare_layer_stepper_params(wf_s, bf_s, wc_s, bc_s,
                                                compute_dtype=jnp.float32)
    out_multi = jax.block_until_ready(layer_stepper(z, a, params_multi))

    z_ref = z_np.copy()
    for t in range(num_steps):
        z_ref = (z_ref @ np.asarray(wf_s[t], np.float64).T + np.asarray(bf_s[t], np.float64)
                 + a_np @ np.asarray(wc_s[t], np.float64).T + np.asarray(bc_s[t], np.float64))
    assert out_multi.shape == (batch, hidden_dim)
    assert np.allclose(np.asarray(out_multi, np.float64), z_ref, atol=2e-2, rtol=2e-2), \
        "fused multi-step mismatch vs reference loop"

    # --- bf16 weights/compute (MXU-native) with f32 accumulation ---
    params_bf16 = prepare_layer_stepper_params(wf, bf, wc, bc)  # bf16 default
    out_bf16 = jax.block_until_ready(layer_stepper(z, a, params_bf16))
    assert np.allclose(np.asarray(out_bf16, np.float64), ref1, atol=1e-1, rtol=1e-1), \
        "bf16 path mismatch vs reference"

    print("KERNEL_OK")
</pallas_src>

<mosaic_0001>
module attributes {stable_mosaic.version = 11 : i64} {
  func.func @_layer_stepper_kernel(%arg0: i32, %arg1: i32, %arg2: memref<8x32xf32, #tpu.memory_space<vmem>>, %arg3: memref<8x16xf32, #tpu.memory_space<vmem>>, %arg4: memref<1x32x32xf32, #tpu.memory_space<vmem>>, %arg5: memref<1x16x32xf32, #tpu.memory_space<vmem>>, %arg6: memref<1x1x32xf32, #tpu.memory_space<vmem>>, %arg7: memref<8x32xf32, #tpu.memory_space<vmem>>, %arg8: memref<8x32xf32, #tpu.memory_space<vmem>>) attributes {dimension_semantics = [#tpu.dimension_semantics<parallel>, #tpu.dimension_semantics<arbitrary>], iteration_bounds = array<i64: 1, 1>, scalar_prefetch = 0 : i64, scratch_operands = 1 : i64, tpu.core_type = #tpu.core_type<tc>, window_params = [{transform_indices = @transform_0, window_bounds = array<i64: 8, 32>}, {transform_indices = @transform_1, window_bounds = array<i64: 8, 16>}, {transform_indices = @transform_2, window_bounds = array<i64: 1, 32, 32>}, {transform_indices = @transform_3, window_bounds = array<i64: 1, 16, 32>}, {transform_indices = @transform_4, window_bounds = array<i64: 1, 1, 32>}, {transform_indices = @transform_5, window_bounds = array<i64: 8, 32>}]} {
    %c0_i32 = arith.constant 0 : i32
    %0 = arith.cmpi eq, %arg1, %c0_i32 : i32
    %1 = arith.extui %0 : i1 to i32
    %c0_i32_0 = arith.constant 0 : i32
    %2 = arith.cmpi ne, %1, %c0_i32_0 : i32
    scf.if %2 {
      %c0_18 = arith.constant 0 : index
      %c0_19 = arith.constant 0 : index
      %20 = vector.load %arg2[%c0_18, %c0_19] : memref<8x32xf32, #tpu.memory_space<vmem>>, vector<8x32xf32>
      %c0_20 = arith.constant 0 : index
      %c0_21 = arith.constant 0 : index
      %21 = vector.load %arg8[%c0_20, %c0_21] : memref<8x32xf32, #tpu.memory_space<vmem>>, vector<8x32xf32>
      tpu.vector_store %arg8[%c0_20, %c0_21], %20 {strides = array<i32>} : memref<8x32xf32, #tpu.memory_space<vmem>>, vector<8x32xf32>,
    } else {
    }
    %c0 = arith.constant 0 : index
    %c0_1 = arith.constant 0 : index
    %3 = vector.load %arg8[%c0, %c0_1] : memref<8x32xf32, #tpu.memory_space<vmem>>, vector<8x32xf32>
    %c0_2 = arith.constant 0 : index
    %c0_3 = arith.constant 0 : index
    %c0_4 = arith.constant 0 : index
    %4 = vector.load %arg4[%c0_2, %c0_3, %c0_4] : memref<1x32x32xf32, #tpu.memory_space<vmem>>, vector<1x32x32xf32>
    %5 = vector.shape_cast %4 : vector<1x32x32xf32> to vector<32x32xf32>
    %cst = arith.constant dense<0.000000e+00> : vector<8x32xf32>
    %6 = tpu.matmul %3, %5, %cst {dimension_numbers = #tpu.dot_dimension_numbers<[1], [0], [0], [1], [0, 0, 1, 1], [], []>, precision = #tpu.contract_precision<fp32>} : vector<8x32xf32>, vector<32x32xf32>, vector<8x32xf32> -> vector<8x32xf32>
    %c0_5 = arith.constant 0 : index
    %c0_6 = arith.constant 0 : index
    %7 = vector.load %arg3[%c0_5, %c0_6] : memref<8x16xf32, #tpu.memory_space<vmem>>, vector<8x16xf32>
    %c0_7 = arith.constant 0 : index
    %c0_8 = arith.constant 0 : index
    %c0_9 = arith.constant 0 : index
    %8 = vector.load %arg5[%c0_7, %c0_8, %c0_9] : memref<1x16x32xf32, #tpu.memory_space<vmem>>, vector<1x16x32xf32>
    %9 = vector.shape_cast %8 : vector<1x16x32xf32> to vector<16x32xf32>
    %cst_10 = arith.constant dense<0.000000e+00> : vector<8x32xf32>
    %10 = tpu.matmul %7, %9, %cst_10 {dimension_numbers = #tpu.dot_dimension_numbers<[1], [0], [0], [1], [0, 0, 1, 1], [], []>, precision = #tpu.contract_precision<fp32>} : vector<8x16xf32>, vector<16x32xf32>, vector<8x32xf32> -> vector<8x32xf32>
    %11 = arith.addf %6, %10 : vector<8x32xf32>
    %c0_11 = arith.constant 0 : index
    %c0_12 = arith.constant 0 : index
    %c0_13 = arith.constant 0 : index
    %12 = vector.load %arg6[%c0_11, %c0_12, %c0_13] : memref<1x1x32xf32, #tpu.memory_space<vmem>>, vector<1x1x32xf32>
    %13 = vector.shape_cast %12 : vector<1x1x32xf32> to vector<1x32xf32>
    %14 = vector.broadcast %13 : vector<1x32xf32> to vector<8x32xf32>
    %15 = arith.addf %11, %14 : vector<8x32xf32>
    %c0_14 = arith.constant 0 : index
    %c0_15 = arith.constant 0 : index
    %16 = vector.load %arg8[%c0_14, %c0_15] : memref<8x32xf32, #tpu.memory_space<vmem>>, vector<8x32xf32>
    tpu.vector_store %arg8[%c0_14, %c0_15], %15 {strides = array<i32>} : memref<8x32xf32, #tpu.memory_space<vmem>>, vector<8x32xf32>,
    %c0_i32_16 = arith.constant 0 : i32
    %17 = arith.cmpi eq, %arg1, %c0_i32_16 : i32
    %18 = arith.extui %17 : i1 to i32
    %c0_i32_17 = arith.constant 0 : i32
    %19 = arith.cmpi ne, %18, %c0_i32_17 : i32
    scf.if %19 {
      %c0_18 = arith.constant 0 : index
      %c0_19 = arith.constant 0 : index
      %20 = vector.load %arg7[%c0_18, %c0_19] : memref<8x32xf32, #tpu.memory_space<vmem>>, vector<8x32xf32>
      tpu.vector_store %arg7[%c0_18, %c0_19], %15 {strides = array<i32>} : memref<8x32xf32, #tpu.memory_space<vmem>>, vector<8x32xf32>,
    } else {
    }
    return
  }
  func.func @transform_0(%arg0: i32, %arg1: i32) -> (i32, i32) {
    %c0_i32 = arith.constant 0 : i32
    %c0_i32_0 = arith.constant 0 : i32
    return %arg0, %c0_i32 : i32, i32
  }
  func.func @transform_1(%arg0: i32, %arg1: i32) -> (i32, i32) {
    %c0_i32 = arith.constant 0 : i32
    %c0_i32_0 = arith.constant 0 : i32
    return %arg0, %c0_i32 : i32, i32
  }
  func.func @transform_2(%arg0: i32, %arg1: i32) -> (i32, i32, i32) {
    %c0_i32 = arith.constant 0 : i32
    %c0_i32_0 = arith.constant 0 : i32
    %c0_i32_1 = arith.constant 0 : i32
    return %arg1, %c0_i32, %c0_i32_0 : i32, i32, i32
  }
  func.func @transform_3(%arg0: i32, %arg1: i32) -> (i32, i32, i32) {
    %c0_i32 = arith.constant 0 : i32
    %c0_i32_0 = arith.constant 0 : i32
    %c0_i32_1 = arith.constant 0 : i32
    return %arg1, %c0_i32, %c0_i32_0 : i32, i32, i32
  }
  func.func @transform_4(%arg0: i32, %arg1: i32) -> (i32, i32, i32) {
    %c0_i32 = arith.constant 0 : i32
    %c0_i32_0 = arith.constant 0 : i32
    %c0_i32_1 = arith.constant 0 : i32
    return %arg1, %c0_i32, %c0_i32_0 : i32, i32, i32
  }
  func.func @transform_5(%arg0: i32, %arg1: i32) -> (i32, i32) {
    %c0_i32 = arith.constant 0 : i32
    %c0_i32_0 = arith.constant 0 : i32
    return %arg0, %c0_i32 : i32, i32
  }
}

</mosaic_0001>

<bundles_post_ra>
// kernel: tpu_custom_call.1
= control target key start
LH: loop header
LB: loop body
LE: loop exit
PB: predicated region body
PF: predicated region fallthrough
CT: control target
= control target key end

     0   :  { %10 = vsyncpa [#allocation4], 0  ;;  %s718_s0 = inlined_call_operand.hbm [shape: f32[8,32], index: 0, kind: input, shape index: {}]   ;;  %s719_s1 = inlined_call_operand.hbm [shape: f32[8,16], index: 1, kind: input, shape index: {}]   ;;  %s720_s2 = inlined_call_operand.hbm [shape: f32[1,32,32], index: 2, kind: input, shape index: {}]   ;;  %s721_s3 = inlined_call_operand.hbm [shape: f32[1,16,32], index: 3, kind: input, shape index: {}]   ;;  %s722_s4 = inlined_call_operand.vmem [shape: f32[1,1,32], index: 4, kind: input, shape index: {}]   ;;  %s723_s5 = inlined_call_operand.hbm [shape: f32[8,32], index: 5, kind: output, shape index: {}]  }
   0x1   :  { %11 = vsyncpa [#allocation7], 0 }
   0x2   :  { %12 = vsyncpa [#allocation10], 0  ;;  %s30_s20 = sshll.u32 %s719_s1, 4  ;;  %s31_s20 = int_to_ptr.hbm [resolvable:$true] %s30_s20 }
   0x3   :  { %13 = vsyncpa [#allocation5], 0  ;;  %s612_s21 = smov [#allocation6]   ;;  %s19_s25 = sshll.u32 %s718_s0, 4  ;;  %s20_s25 = int_to_ptr.hbm [resolvable:$true] %s19_s25 }
   0x4   :  { %s32_s22 = sshll.u32 %s612_s21, 4  ;;  %s613_s26 = smov [#allocation3]   ;;  %s33_s22 = int_to_ptr.vmem [resolvable:$true] %s32_s22 }
   0x5   :  { %35 = dma.hbm_to_vmem [thread:$0]  %s31_s20, 128, %s33_s22, [#allocation7]  }
   0x6   :  { %s21_s27 = sshll.u32 %s613_s26, 4  ;;  %s40_s30 = sshll.u32 %s720_s2, 4  ;;  %s22_s27 = int_to_ptr.vmem [resolvable:$true] %s21_s27  ;;  %s41_s30 = int_to_ptr.hbm [resolvable:$true] %s40_s30 }
   0x7   :  { %24 = dma.hbm_to_vmem [thread:$0]  %s20_s25, 128, %s22_s27, [#allocation4]  }
   0x8   :  { %s614_s1 = smov [#allocation8]   ;;  %s53_s9 = sshll.u32 %s721_s3, 4  ;;  %s54_s9 = int_to_ptr.hbm [resolvable:$true] %s53_s9 }
   0x9   :  { %s42_s6 = sshll.u32 %s614_s1, 4  ;;  %s615_s10 = smov 128   ;;  %s43_s6 = int_to_ptr.vmem [resolvable:$true] %s42_s6 }
   0xa   :  { %s616_s0 = smov 8   ;;  %s617_s11 = smov [#allocation9]  }
   0xb   :  { %48 = dma.hbm_to_vmem [thread:$0]  %s41_s30, 512, %s43_s6, [#allocation7], %s615_s10, %s615_s10, %s616_s0  }
   0xc   :  { %s55_s12 = sshll.u32 %s617_s11, 4  ;;  %s56_s12 = int_to_ptr.vmem [resolvable:$true] %s55_s12 }
   0xd   :  { %61 = dma.hbm_to_vmem [thread:$0]  %s54_s9, 256, %s56_s12, [#allocation10], %s615_s10, %s615_s10, %s616_s0  }
   0xe   :  { %604 = dma.done.wait [#allocation4], 128  }
   0xf   :  { %605 = vsyncadd [#allocation4], 4294967168 }
  0x10   :  { %606 = dma.done.wait [#allocation7], 640  }
  0x11   :  { %607 = vsyncadd [#allocation7], 4294966656 }
  0x12   :  { %608 = dma.done.wait [#allocation10], 256  }
  0x13   :  { %609 = vsyncadd [#allocation10], 4294967040  ;;  %vm95_vm0 = vcmask 130048   ;;  %v94_v0 = vld [vmem:[#allocation9 + $0x8] sm:$0xff]  ;;  %v93_v1 = vld [vmem:[#allocation9] sm:$0xff]  ;;  %vm85_vm1 = vcmask 261120  }
  0x14   :  { %v92_v2 = vld [vmem:[#allocation6] sm:$0xff]  ;;  %v661_v3 = vand.u32 4294901760, %v94_v0  ;;  %v663_v4 = vand.u32 4294901760, %v93_v1  ;;  %v90_v7 = vld [vmem:[#allocation8 + $0x10] sm:$0xff]  ;;  %v89_v8 = vld [vmem:[#allocation8 + $0x8] sm:$0xff]  ;;  %s618_s13 = smov [#allocation11]  }
  0x15   :  { %v97_v5 = vsel %vm95_vm0, %v92_v2, 0  ;;  %v91_v6 = vld [vmem:[#allocation8 + $0x18] sm:$0xff]  ;;  %v669_v11 = vand.u32 4294901760, %v90_v7  ;;  %v671_v12 = vand.u32 4294901760, %v89_v8  ;;  %v88_v13 = vld [vmem:[#allocation8] sm:$0xff]  ;;  %v84_v14 = vld [vmem:[#allocation3] sm:$0xff] }
  0x16   :  { %v665_v9 = vand.u32 4294901760, %v97_v5  ;;  %v667_v10 = vand.u32 4294901760, %v91_v6  ;;  %v141_v15 = vsub.f32 %v94_v0, %v661_v3  ;;  %114 = vmatpush.msra.mxu0 %v661_v3  ;;  %v147_v16 = vsub.f32 %v93_v1, %v663_v4  ;;  %198 = vmatpush.msra.mxu3 %v661_v3  ;;  %86 = vst.msk [vmem:[#allocation2] sm:$0xff] %vm85_vm1, %v84_v14  ;;  %s462_s14 = sshll.u32 %s618_s13, 4  ;;  %s464_s17 = sshll.u32 %s723_s5, 4  ;;  %s463_s14 = int_to_ptr.vmem [resolvable:$true] %s462_s14  ;;  %s465_s17 = int_to_ptr.hbm [resolvable:$true] %s464_s17 }
  0x17   :  { %v677_v17 = vand.u32 4294901760, %v88_v13  ;;  %v310_v20 = vsub.f32 %v90_v7, %v669_v11  ;;  %v684_v21 = vsub.f32 %v89_v8, %v671_v12 }
  0x18   :  { %v118_v18 = vsub.f32 %v97_v5, %v665_v9  ;;  %v304_v19 = vsub.f32 %v91_v6, %v667_v10  ;;  %173 = vmatpush.msra.mxu2 %v141_v15  ;;  %116 = vmatpush.msra.mxu0 %v663_v4  ;;  %v142_v22 = vand.u32 4294901760, %v141_v15  ;;  %v148_v23 = vand.u32 4294901760, %v147_v16 }
  0x19   :  { %v322_v24 = vsub.f32 %v88_v13, %v677_v17  ;;  %200 = vmatpush.msra.mxu3 %v663_v4  ;;  %v311_v27 = vand.u32 4294901760, %v310_v20  ;;  %v317_v28 = vand.u32 4294901760, %v684_v21 }
  0x1a   :  { %v119_v25 = vand.u32 4294901760, %v118_v18  ;;  %v305_v26 = vand.u32 4294901760, %v304_v19  ;;  %176 = vmatpush.msra.mxu2 %v147_v16  ;;  %v143_v29 = vsub.f32 %v141_v15, %v142_v22  ;;  %v149_v30 = vsub.f32 %v147_v16, %v148_v23  ;;  %225 = vmatpush.msrb.mxu0 %v142_v22 }
  0x1b   :  { %v323_v31 = vand.u32 4294901760, %v322_v24  ;;  %179 = vmatmul.f32.vlgmr.msra.gmra.mxu2 %v118_v18  ;;  %v312_v34 = vsub.f32 %v310_v20, %v311_v27  ;;  %v318_v37 = vsub.f32 %v684_v21, %v317_v28 }
  0x1c   :  { %v120_v32 = vsub.f32 %v118_v18, %v119_v25  ;;  %204 = vmatmul.f32.vlgmr.msra.gmra.mxu3 %v119_v25  ;;  %v306_v33 = vsub.f32 %v304_v19, %v305_v26  ;;  %v144_v35 = vand.u32 4294901760, %v143_v29  ;;  %275 = vmatpush.msrb.mxu2 %v667_v10  ;;  %v150_v36 = vand.u32 4294901760, %v149_v30 }
  0x1d   :  { %229 = vmatpush.msrb.mxu0 %v148_v23  ;;  %v313_v40 = vand.u32 4294901760, %v312_v34  ;;  %v87_v41 = vld [vmem:[#allocation2] sm:$0xff]  ;;  %v324_v42 = vsub.f32 %v322_v24, %v323_v31  ;;  %v319_v44 = vand.u32 4294901760, %v318_v37 }
  0x1e   :  { %v121_v38 = vand.u32 4294901760, %v120_v32  ;;  %v307_v39 = vand.u32 4294901760, %v306_v33  ;;  %145 = vmatpush.msra.mxu1 %v144_v35  ;;  %277 = vmatpush.msrb.mxu2 %v669_v11  ;;  %v260_v43 = vsel %vm85_vm1, %v87_v41, 0 }
  0x1f   :  { %v282_v45 = vand.u32 4294901760, %v260_v43  ;;  %v325_v47 = vand.u32 4294901760, %v324_v42 }
  0x20   :  { %122 = vmatmul.f32.vlgmr.msra.gmra.mxu0 %v121_v38  ;;  %308 = vmatpush.msrb.mxu3 %v307_v39 }
  0x21   :  { %151 = vmatpush.msra.mxu1 %v150_v36  ;;  %279 = vmatpush.msrb.mxu2 %v671_v12  ;;  %v283_v46 = vsub.f32 %v260_v43, %v282_v45 }
  0x22   :  { %153 = vmatmul.f32.vlgmr.msra.gmra.mxu1 %v665_v9  ;;  %314 = vmatpush.msrb.mxu3 %v313_v40 }
  0x23   :  { %250 = vmatpush.msrb.mxu1 %v661_v3  ;;  %281 = vmatpush.msrb.mxu2 %v677_v17  ;;  %v284_v48 = vand.u32 4294901760, %v283_v46 }
  0x24   :  { %320 = vmatpush.msrb.mxu3 %v319_v44  ;;  %346 = vmatpush.msra.mxu0 %v304_v19 }
  0x25   :  { %404 = vmatpush.msra.mxu2 %v305_v26  ;;  %252 = vmatpush.msrb.mxu1 %v663_v4  ;;  %v285_v49 = vsub.f32 %v283_v46, %v284_v48 }
  0x26   :  { %326 = vmatpush.msrb.mxu3 %v325_v47  ;;  %349 = vmatpush.msra.mxu0 %v310_v20 }
  0x27   :  { %408 = vmatpush.msra.mxu2 %v311_v27  ;;  %328 = vmatmul.f32.vlgmr.msrb.gmra.mxu3 %v282_v45  ;;  %v286_v50 = vand.u32 4294901760, %v285_v49 }
  0x28   :  { %231 = vmatmul.f32.vlgmr.msrb.gmra.mxu0 %v665_v9  ;;  %435 = vmatpush.msra.mxu3 %v667_v10 }
  0x29   :  { %375 = vmatpush.msra.mxu1 %v667_v10  ;;  %412 = vmatpush.msra.mxu2 %v317_v28 }
  0x2a   :  { %287 = vmatmul.f32.vlgmr.msrb.gmra.mxu2 %v286_v50  ;;  %254 = vmatmul.f32.vlgmr.msrb.gmra.mxu1 %v665_v9  ;;  %v483_v9 = vld [vmem:[%s722_s4] ss:$0 sm:$0xff] }
  0x2b   :  { %437 = vmatpush.msra.mxu3 %v669_v11  ;;  %352 = vmatpush.msra.mxu0 %v684_v21 }
  0x2c   :  { %377 = vmatpush.msra.mxu1 %v669_v11  ;;  %416 = vmatpush.msra.mxu2 %v323_v31 }
  0x2d   :  { %439 = vmatpush.msra.mxu3 %v671_v12  ;;  %355 = vmatpush.msra.mxu0 %v322_v24 }
  0x2e   :  { %379 = vmatpush.msra.mxu1 %v671_v12 }
  0x2f   :  { %441 = vmatpush.msra.mxu3 %v677_v17 }
  0x30   :  { %358 = vmatmul.f32.vlgmr.msra.gmra.mxu0 %v283_v46  ;;  %381 = vmatpush.msra.mxu1 %v677_v17 }
  0x31   :  { %443 = vmatmul.f32.vlgmr.msra.gmra.mxu3 %v282_v45 }
  0x32   :  { %418 = vmatmul.f32.vlgmr.msra.gmra.mxu2 %v282_v45  ;;  %385 = vmatmul.f32.vlgmr.msra.gmra.mxu1 %v284_v48 }
  0x9d   :  { %v123_v51 = vpop.f32.mrf.mxu0 }
  0x9e   :  { %v180_v53 = vpop.f32.mrf.mxu2 }
  0x9f   :  { %v154_v52 = vpop.f32.mrf.mxu1  ;;  %v205_v55 = vpop.f32.mrf.mxu3 }
  0xa0   :  { %v155_v54 = vadd.f32 %v154_v52, %v123_v51 }
  0xa2   :  { %v181_v56 = vadd.f32 %v180_v53, %v155_v54 }
  0xa4   :  { %v206_v57 = vadd.f32 %v205_v55, %v181_v56 }
  0xa5   :  { %v232_v58 = vpop.f32.mrf.mxu0 }
  0xa6   :  { %v233_v59 = vadd.f32 %v232_v58, %v206_v57 }
  0xa7   :  { %v255_v60 = vpop.f32.mrf.mxu1 }
  0xa8   :  { %v256_v62 = vadd.f32 %v255_v60, %v233_v59 }
  0xaa   :  { %v329_v61 = vpop.f32.mrf.mxu3 }
  0xad   :  { %v288_v63 = vpop.f32.mrf.mxu2  ;;  %v359_v1 = vpop.f32.mrf.mxu0 }
  0xae   :  { %v289_v0 = vadd.f32 %v288_v63, %v256_v62 }
  0xaf   :  { %v386_v3 = vpop.f32.mrf.mxu1 }
  0xb0   :  { %v330_v2 = vadd.f32 %v329_v61, %v289_v0 }
  0xb2   :  { %v360_v4 = vadd.f32 %v359_v1, %v330_v2 }
  0xb4   :  { %v387_v5 = vadd.f32 %v386_v3, %v360_v4  ;;  %v444_v7 = vpop.f32.mrf.mxu3 }
  0xb5   :  { %v419_v6 = vpop.f32.mrf.mxu2 }
  0xb6   :  { %v420_v8 = vadd.f32 %v419_v6, %v387_v5 }
  0xb8   :  { %v445_v10 = vadd.f32 %v444_v7, %v420_v8 }
  0xba   :  { %v451_v11 = vadd.f32 %v483_v9, %v445_v10 }
  0xbc   :  { %452 = vst.msk [vmem:[#allocation2] sm:$0xff] %vm85_vm1, %v451_v11 }
  0xbd   :  { %456 = vst.msk [vmem:[#allocation11] sm:$0xff] %vm85_vm1, %v451_v11 }
  0xbe   :  { %467 = dma.vmem_to_hbm [thread:$0]  %s463_s14, 128, %s465_s17, [#allocation5]  }
  0xbf   :  { %610 = dma.done.wait [#allocation5], 128  }
  0xc0   :  { %611 = vsyncadd [#allocation5], 4294967168 }
  0xc1   :  { %472 = vsyncpa [#allocation4], 1 }
  0xc2   :  { %473 = vsyncpa [#allocation7], 1 }
  0xc3   :  { %474 = vsyncpa [#allocation10], 1 }
  0xc4   :  { %475 = vsyncpa [#allocation5], 1 }

</bundles_post_ra>
